<compile_context>
chip_gen: v6e
topology: v6e:2x2x1
jax: 0.10.0
libtpu: 0.0.40
codegen_flags: <defaults>
</compile_context>

<pallas_src>
import functools

import jax
import jax.numpy as jnp
from jax import lax
from jax.experimental import pallas as pl
from jax.experimental.pallas import tpu as pltpu


def _token_logits_kernel(table_ref, w_ref, out_ref):
    # logits[v] = dot(table[v, :], w_scaled)   (mean's 1/S already folded into w)
    out_ref[...] = jnp.sum(
        table_ref[...].astype(jnp.float32) * w_ref[...], axis=-1, keepdims=True
    )


def _gather_sum_kernel(ids_ref, logits_ref, bias_ref, out_ref, *, seq_len, batch, tb):
    # ids_ref:    (S*B,) int32, SMEM (scalar prefetch), flattened s-major
    # logits_ref: (V, 1) f32, VMEM-resident per-token scores (tiny: 4 bytes/token)
    # bias_ref:   (1,)   f32, SMEM
    # out_ref:    (tb,1) f32 output tile
    j = pl.program_id(0)  # batch tile ("parallel")
    base = j * tb

    def body_b(b, carry):
        col = base + b

        def body_s(s, acc):
            tok = ids_ref[s * batch + col]
            return acc + logits_ref[pl.ds(tok, 1), :]

        acc = lax.fori_loop(0, seq_len, body_s, jnp.zeros((1, 1), jnp.float32))
        out_ref[pl.ds(b, 1), :] = acc + bias_ref[0]
        return carry

    lax.fori_loop(0, tb, body_b, 0)


def _pick_batch_tile(batch):
    # Multiple of 8 (sublane / block-shape rule); >=2 tiles for v7x megacore
    # when the batch allows; otherwise one full-array tile.
    if batch % 8 != 0 or batch < 16:
        return batch
    upper = min(256, (batch // 2) // 8 * 8)
    for tb in range(upper, 0, -8):
        if batch % tb == 0:
            return tb
    return batch


def baseline_forward(embedding_table, fc_w, fc_b, x):
    """embedding_table: (V, D); fc_w: (1, D) torch nn.Linear layout; fc_b: (1,);
    x: (S, B) int token ids.  Returns (B,) f32."""
    S, B = x.shape
    V, D = embedding_table.shape

    # ---- Phase 1: per-token logits = table @ (w / S)^T, tiled over V ----------
    w_scaled = (fc_w.astype(jnp.float32) / S).reshape(1, D)  # fold mean's 1/S
    # TODO(synk): for a vocabulary that is both huge and not a multiple of 8,
    # pad V up to a multiple of 8 before tiling this kernel.
    tv = V if V % 8 != 0 else min(V, 512)
    logits = pl.pallas_call(
        _token_logits_kernel,
        out_shape=jax.ShapeDtypeStruct((V, 1), jnp.float32),
        grid=(pl.cdiv(V, tv),),
        in_specs=[
            pl.BlockSpec((tv, D), lambda i: (i, 0)),   # table streamed tile-by-tile
            pl.BlockSpec((1, D), lambda i: (0, 0)),    # pre-scaled fc weight
        ],
        out_specs=pl.BlockSpec((tv, 1), lambda i: (i, 0)),
        compiler_params=pltpu.CompilerParams(dimension_semantics=("parallel",)),
    )(embedding_table, w_scaled)

    # ---- Phase 2: out[b] = sum_s logits[x[s, b]] + bias -----------------------
    tb = _pick_batch_tile(B)
    ids_flat = x.astype(jnp.int32).reshape(S * B)      # 1D SMEM: tight padding
    bias = fc_b.astype(jnp.float32).reshape(1)

    kernel = functools.partial(_gather_sum_kernel, seq_len=S, batch=B, tb=tb)
    out = pl.pallas_call(
        kernel,
        out_shape=jax.ShapeDtypeStruct((B, 1), jnp.float32),
        grid_spec=pltpu.PrefetchScalarGridSpec(
            num_scalar_prefetch=1,                      # token ids -> SMEM
            grid=(B // tb,),
            in_specs=[
                # per-token logits resident in VMEM (constant block index)
                pl.BlockSpec((V, 1), lambda j, ids: (0, 0)),
                # bias scalar in SMEM (no padded VMEM tile)
                pl.BlockSpec(memory_space=pltpu.MemorySpace.SMEM),
            ],
            out_specs=pl.BlockSpec((tb, 1), lambda j, ids: (j, 0)),
        ),
        compiler_params=pltpu.CompilerParams(dimension_semantics=("parallel",)),
    )(ids_flat, logits, bias)

    return out[:, 0]                                    # squeeze(1)


if __name__ == "__main__":
    # Small, deterministic setup.
    SEQ, BATCH = 8, 8
    VOCAB, EMB = 50, 32

    key = jax.random.PRNGKey(0)
    k_vec, k_w, k_b, k_x = jax.random.split(key, 4)

    # "Pretrained" embedding vectors (nn.Embedding.from_pretrained(vocab.vectors))
    embedding_table = jax.random.normal(k_vec, (VOCAB, EMB), dtype=jnp.float32)
    # nn.Linear(embedding_dim, 1): weight (1, EMB), bias (1,)
    bound = 1.0 / (EMB ** 0.5)
    fc_w = jax.random.uniform(k_w, (1, EMB), minval=-bound, maxval=bound,
                              dtype=jnp.float32)
    fc_b = jax.random.uniform(k_b, (1,), minval=-bound, maxval=bound,
                              dtype=jnp.float32)

    # Token ids, shape (S, B) as in torchtext batch-second convention.
    x = jax.random.randint(k_x, (SEQ, BATCH), 0, VOCAB, dtype=jnp.int32)

    out = baseline_forward(embedding_table, fc_w, fc_b, x)
    out = jax.block_until_ready(out)

    # Pure-JAX reference for sanity.
    ref = (jnp.take(embedding_table, x, axis=0).mean(0) @ fc_w.T + fc_b)[:, 0]
    assert out.shape == (BATCH,)
    assert jnp.allclose(out, ref, atol=1e-5, rtol=1e-5)

    print("KERNEL_OK")
</pallas_src>

<mosaic_0001>
module attributes {stable_mosaic.version = 11 : i64} {
  func.func @_token_logits_kernel(%arg0: i32, %arg1: memref<50x32xf32, #tpu.memory_space<vmem>>, %arg2: memref<1x32xf32, #tpu.memory_space<vmem>>, %arg3: memref<50x1xf32, #tpu.memory_space<vmem>>) attributes {dimension_semantics = [#tpu.dimension_semantics<parallel>], iteration_bounds = array<i64: 1>, scalar_prefetch = 0 : i64, scratch_operands = 0 : i64, tpu.core_type = #tpu.core_type<tc>, window_params = [{transform_indices = @transform_0, window_bounds = array<i64: 50, 32>}, {pipeline_mode = #tpu.pipeline_mode<synchronous>, transform_indices = @transform_1, window_bounds = array<i64: 1, 32>}, {transform_indices = @transform_2, window_bounds = array<i64: 50, 1>}]} {
    %c0 = arith.constant 0 : index
    %c0_0 = arith.constant 0 : index
    %0 = vector.load %arg1[%c0, %c0_0] : memref<50x32xf32, #tpu.memory_space<vmem>>, vector<50x32xf32>
    %c0_1 = arith.constant 0 : index
    %c0_2 = arith.constant 0 : index
    %1 = vector.load %arg2[%c0_1, %c0_2] : memref<1x32xf32, #tpu.memory_space<vmem>>, vector<1x32xf32>
    %2 = vector.broadcast %1 : vector<1x32xf32> to vector<50x32xf32>
    %3 = arith.mulf %0, %2 : vector<50x32xf32>
    %cst = arith.constant dense<0.000000e+00> : vector<50xf32>
    %4 = vector.multi_reduction <add>, %3, %cst [1] : vector<50x32xf32> to vector<50xf32>
    %5 = vector.shape_cast %4 : vector<50xf32> to vector<50x1xf32>
    %c0_3 = arith.constant 0 : index
    %c0_4 = arith.constant 0 : index
    %6 = vector.load %arg3[%c0_3, %c0_4] : memref<50x1xf32, #tpu.memory_space<vmem>>, vector<50x1xf32>
    tpu.vector_store %arg3[%c0_3, %c0_4], %5 {strides = array<i32>} : memref<50x1xf32, #tpu.memory_space<vmem>>, vector<50x1xf32>,
    return
  }
  func.func @transform_0(%arg0: i32) -> (i32, i32) {
    %c0_i32 = arith.constant 0 : i32
    %c0_i32_0 = arith.constant 0 : i32
    return %arg0, %c0_i32 : i32, i32
  }
  func.func @transform_1(%arg0: i32) -> (i32, i32) {
    %c0_i32 = arith.constant 0 : i32
    %c0_i32_0 = arith.constant 0 : i32
    %c0_i32_1 = arith.constant 0 : i32
    return %c0_i32, %c0_i32_0 : i32, i32
  }
  func.func @transform_2(%arg0: i32) -> (i32, i32) {
    %c0_i32 = arith.constant 0 : i32
    %c0_i32_0 = arith.constant 0 : i32
    return %arg0, %c0_i32 : i32, i32
  }
}

</mosaic_0001>

<bundles_post_ra>
// kernel: tpu_custom_call.1
= control target key start
LH: loop header
LB: loop body
LE: loop exit
PB: predicated region body
PF: predicated region fallthrough
CT: control target
= control target key end

     0   :  { %vm32_vm0 = vcmask 261120   ;;  %vm51_vm1 = vcmask 254976   ;;  %vm55_vm2 = vcmask 7168   ;;  %vm62_vm3 = vcmask 1024   ;;  %s135_s0 = inlined_call_operand.vmem [shape: f32[50,32], index: 0, kind: input, shape index: {}]   ;;  %s136_s1 = inlined_call_operand.vmem [shape: f32[1,32], index: 1, kind: input, shape index: {}]   ;;  %s137_s2 = inlined_call_operand.vmem [shape: f32[50,1], index: 2, kind: output, shape index: {}]  }
   0x1   :  { %v11_v0 = vld [vmem:[%s135_s0] sm:$0xff]  ;;  %v13_v2 = vld [vmem:[%s135_s0 + $0x10] sm:$0xff]  ;;  %v12_v5 = vld [vmem:[%s135_s0 + $0x8] sm:$0xff] }
   0x2   :  { %v68_v1 = vld [vmem:[%s136_s1] ss:$0 sm:$0xff]  ;;  %v14_v6 = vld [vmem:[%s135_s0 + $0x18] sm:$0xff]  ;;  %v16_v10 = vld [vmem:[%s135_s0 + $0x28] sm:$0xff] }
   0x3   :  { %v25_v3 = vmul.f32 %v68_v1, %v11_v0  ;;  %v27_v4 = vmul.f32 %v68_v1, %v13_v2  ;;  %v26_v7 = vmul.f32 %v68_v1, %v12_v5  ;;  %v28_v8 = vmul.f32 %v68_v1, %v14_v6  ;;  %v15_v9 = vld [vmem:[%s135_s0 + $0x20] sm:$0xff]  ;;  %v17_v17 = vld [vmem:[%s135_s0 + $0x30] sm:$0x3] }
   0x4   :  { %v29_v15 = vmul.f32 %v68_v1, %v15_v9  ;;  %v30_v16 = vmul.f32 %v68_v1, %v16_v10  ;;  %v31_v20 = vmul.f32 %v68_v1, %v17_v17 }
   0x5   :  { %v33_v11 = vsel %vm32_vm0, %v25_v3, 0.0  ;;  %v39_v12 = vsel %vm32_vm0, %v27_v4, 0.0  ;;  %v36_v13 = vsel %vm32_vm0, %v26_v7, 0.0  ;;  %v42_v14 = vsel %vm32_vm0, %v28_v8, 0.0 }
   0x6   :  { %34 = vadd.xlane.f32.xlu0 %v33_v11  ;;  %40 = vadd.xlane.f32.xlu1 %v39_v12  ;;  %v45_v18 = vsel %vm32_vm0, %v29_v15, 0.0  ;;  %v48_v19 = vsel %vm32_vm0, %v30_v16, 0.0  ;;  %v52_v21 = vsel %vm51_vm1, %v31_v20, 0.0 }
   0xa   :  { %37 = vadd.xlane.f32.xlu0 %v36_v13  ;;  %43 = vadd.xlane.f32.xlu1 %v42_v14 }
   0xe   :  { %46 = vadd.xlane.f32.xlu0 %v45_v18  ;;  %49 = vadd.xlane.f32.xlu1 %v48_v19 }
  0x12   :  { %53 = vadd.xlane.f32.xlu0 %v52_v21 }
  0x8f   :  { %v35_v22 = vpop.xlane.xlu0 %34  ;;  %v41_v23 = vpop.xlane.xlu1 %40 }
  0x90   :  { %56 = vst.msk [vmem:[%s137_s2] sm:$0xff] %vm55_vm2, %v35_v22  ;;  %58 = vst.msk [vmem:[%s137_s2 + $0x10] sm:$0xff] %vm55_vm2, %v41_v23 }
  0x93   :  { %v38_v24 = vpop.xlane.xlu0 %37  ;;  %v44_v25 = vpop.xlane.xlu1 %43 }
  0x94   :  { %57 = vst.msk [vmem:[%s137_s2 + $0x8] sm:$0xff] %vm55_vm2, %v38_v24  ;;  %59 = vst.msk [vmem:[%s137_s2 + $0x18] sm:$0xff] %vm55_vm2, %v44_v25 }
  0x97   :  { %v47_v26 = vpop.xlane.xlu0 %46  ;;  %v50_v27 = vpop.xlane.xlu1 %49 }
  0x98   :  { %60 = vst.msk [vmem:[%s137_s2 + $0x20] sm:$0xff] %vm55_vm2, %v47_v26  ;;  %61 = vst.msk [vmem:[%s137_s2 + $0x28] sm:$0xff] %vm55_vm2, %v50_v27 }
  0x9b   :  { %v54_v28 = vpop.xlane.xlu0 %53 }
  0x9c   :  { %63 = vst.msk [vmem:[%s137_s2 + $0x30] sm:$0x3] %vm62_vm3, %v54_v28 }

</bundles_post_ra>
